<compile_context>
chip_gen: v5e
topology: v5e:2x2
jax: 0.10.0
libtpu: 0.0.40
codegen_flags: <defaults>
</compile_context>

<pallas_src>
import math

import jax
import jax.numpy as jnp
from jax.experimental import pallas as pl
from jax.experimental.pallas import tpu as pltpu


def _gemm_bn_relu_kernel(p_ref, w_ref, b_ref, o_ref):
    """One (batch, M-tile) step: out = relu(W_folded @ patches + bias).

    p_ref: (1, K, TM)    bf16  im2col patches^T (K on sublanes, M on lanes)
    w_ref: (Cout, K)     bf16  conv weights with BN scale folded in
    b_ref: (Cout, 1)     f32   folded BN bias
    o_ref: (1, Cout, TM) bf16  output tile (lane-dense last dim)
    """
    acc = jnp.dot(w_ref[...], p_ref[0], preferred_element_type=jnp.float32)
    y = jnp.maximum(acc + b_ref[...], 0.0)
    o_ref[0] = y.astype(o_ref.dtype)


def _choose_m_tile(m: int, tm_max: int, min_tiles: int):
    """Pick a lane-dense M tile (multiple of 128) that divides M padded to the
    next multiple of 128.  Prefers >= `min_tiles` tiles (megacore) when that is
    achievable without shrinking below 128."""
    tm_max = max(128, (tm_max // 128) * 128)   # clamp to a multiple of 128
    m128 = pl.cdiv(m, 128)                     # number of 128-lane groups
    m_pad = m128 * 128
    max_units = min(tm_max // 128, m128)
    best = None
    for d in range(max_units, 0, -1):          # d*128 = candidate tile
        if m128 % d == 0:
            if best is None:
                best = d                       # fallback: largest divisor that fits
            if m128 // d >= min_tiles:
                best = d
                break
    tm = (best if best is not None else 1) * 128
    return tm, m_pad


def effi_init_block(
    x_nchw,
    weight,          # (Cout, Cin, 3, 3)  -- PyTorch conv weight layout
    gamma,
    beta,
    running_mean,
    running_var,
    *,
    bn_eps: float = 1e-3,
    tf_mode: bool = True,
    compute_dtype=jnp.bfloat16,
    out_dtype=jnp.bfloat16,
    tm_max: int = 8192,
):
    n, cin, h, w_sp = x_nchw.shape
    cout = weight.shape[0]
    stride, k = 2, 3

    # ---- padding (TF-same or fixed padding=1), identical to the PyTorch module ----
    if tf_mode:
        oh = math.ceil(h / stride)
        ow = math.ceil(w_sp / stride)
        pad_h = max((oh - 1) * stride + (k - 1) + 1 - h, 0)
        pad_w = max((ow - 1) * stride + (k - 1) + 1 - w_sp, 0)
        pads_h = (pad_h // 2, pad_h - pad_h // 2)
        pads_w = (pad_w // 2, pad_w - pad_w // 2)
    else:
        pads_h = (1, 1)
        pads_w = (1, 1)

    # Cast to compute dtype BEFORE any layout plumbing so the im2col
    # intermediate is bf16, not f32.
    x = jnp.pad(x_nchw.astype(compute_dtype), ((0, 0), (0, 0), pads_h, pads_w))
    hp, wp = x.shape[2], x.shape[3]
    ho = (hp - k) // stride + 1
    wo = (wp - k) // stride + 1
    m = ho * wo

    # ---- im2col in compute_dtype (layout plumbing, done once by XLA) ----
    # patches[n, (kh*3+kw)*Cin + c, i*Wo + j] = x_pad[n, c, 2i+kh, 2j+kw]
    taps = []
    for kh in range(k):
        for kw in range(k):
            taps.append(
                jax.lax.slice(
                    x,
                    (0, 0, kh, kw),
                    (n, cin, kh + stride * (ho - 1) + 1, kw + stride * (wo - 1) + 1),
                    (1, 1, stride, stride),
                )  # (N, Cin, Ho, Wo)
            )
    patches = jnp.stack(taps, axis=1).reshape(n, k * k * cin, m)  # (N, 9*Cin, M) bf16

    # ---- fold BatchNorm into the weights / bias (f32) ----
    scale = gamma.astype(jnp.float32) / jnp.sqrt(running_var.astype(jnp.float32) + bn_eps)
    w_mat = jnp.transpose(weight.astype(jnp.float32), (0, 2, 3, 1)).reshape(cout, k * k * cin)
    w_mat = w_mat * scale[:, None]                                        # (Cout, 9*Cin)
    bias = (beta.astype(jnp.float32) - running_mean.astype(jnp.float32) * scale).reshape(cout, 1)

    # ---- pad K (sublane-friendly) and choose a lane-dense M tile ----
    kk = k * k * cin
    k_pad = ((kk + 31) // 32) * 32                   # e.g. 27 -> 32
    min_tiles = 2 if n == 1 else 1                   # keep both v7x TCs busy at N==1
    tm, m_pad = _choose_m_tile(m, tm_max, min_tiles)

    patches = jnp.pad(patches, ((0, 0), (0, k_pad - kk), (0, m_pad - m)))
    w_mat = jnp.pad(w_mat, ((0, 0), (0, k_pad - kk))).astype(compute_dtype)

    grid = (n, m_pad // tm)
    out = pl.pallas_call(
        _gemm_bn_relu_kernel,
        out_shape=jax.ShapeDtypeStruct((n, cout, m_pad), out_dtype),
        grid=grid,
        in_specs=[
            pl.BlockSpec((1, k_pad, tm), lambda b, j: (b, 0, j)),
            pl.BlockSpec((cout, k_pad), lambda b, j: (0, 0)),
            pl.BlockSpec((cout, 1), lambda b, j: (0, 0)),
        ],
        out_specs=pl.BlockSpec((1, cout, tm), lambda b, j: (b, 0, j)),
        compiler_params=pltpu.CompilerParams(
            dimension_semantics=("parallel", "parallel"),
        ),
    )(patches, w_mat, bias)

    # (N, Cout, M_pad) -> crop (free when m_pad == m) -> (N, Cout, Ho, Wo)
    if m_pad != m:
        out = out[:, :, :m]
    return out.reshape(n, cout, ho, wo)


def _reference(x_nchw, weight, gamma, beta, running_mean, running_var, *,
               bn_eps, tf_mode, compute_dtype=jnp.float32):
    """Pure-JAX reference (lax conv) mirroring the module; compute_dtype controls
    the precision of the conv operands (f32 = exact module semantics)."""
    n, cin, h, w_sp = x_nchw.shape
    stride, k = 2, 3
    if tf_mode:
        oh = math.ceil(h / stride)
        ow = math.ceil(w_sp / stride)
        pad_h = max((oh - 1) * stride + (k - 1) + 1 - h, 0)
        pad_w = max((ow - 1) * stride + (k - 1) + 1 - w_sp, 0)
        padding = ((pad_h // 2, pad_h - pad_h // 2), (pad_w // 2, pad_w - pad_w // 2))
    else:
        padding = ((1, 1), (1, 1))
    scale = gamma.astype(jnp.float32) / jnp.sqrt(running_var.astype(jnp.float32) + bn_eps)
    bias = beta.astype(jnp.float32) - running_mean.astype(jnp.float32) * scale
    w_folded = weight.astype(jnp.float32) * scale[:, None, None, None]
    y = jax.lax.conv_general_dilated(
        x_nchw.astype(compute_dtype),
        w_folded.astype(compute_dtype),
        window_strides=(stride, stride),
        padding=padding,
        dimension_numbers=("NCHW", "OIHW", "NCHW"),
        preferred_element_type=jnp.float32,
    )
    y = y + bias[None, :, None, None]
    return jnp.maximum(y, 0.0)


if __name__ == "__main__":
    key = jax.random.PRNGKey(0)
    k_x, k_w, k_g, k_b, k_m, k_v = jax.random.split(key, 6)

    # EfficientNet-like small config: RGB input -> 32 channels, 16x16 spatial.
    N, C_IN, H, W = 2, 3, 16, 16
    C_OUT = 32
    BN_EPS = 1e-3
    TF_MODE = True

    x = jax.random.normal(k_x, (N, C_IN, H, W), dtype=jnp.float32)
    weight = jax.random.normal(k_w, (C_OUT, C_IN, 3, 3), dtype=jnp.float32) * 0.1
    gamma = 1.0 + 0.1 * jax.random.normal(k_g, (C_OUT,), dtype=jnp.float32)
    beta = 0.1 * jax.random.normal(k_b, (C_OUT,), dtype=jnp.float32)
    running_mean = 0.1 * jax.random.normal(k_m, (C_OUT,), dtype=jnp.float32)
    running_var = 1.0 + 0.1 * jax.random.uniform(k_v, (C_OUT,), dtype=jnp.float32)

    out = effi_init_block(
        x, weight, gamma, beta, running_mean, running_var,
        bn_eps=BN_EPS, tf_mode=TF_MODE,
    )
    out = jax.block_until_ready(out)
    out_f32 = out.astype(jnp.float32)

    # Tight check vs a reference using the same bf16 operand rounding
    # (f32 accumulation); extra slack for the bf16 output cast.
    ref_bf16 = _reference(
        x, weight, gamma, beta, running_mean, running_var,
        bn_eps=BN_EPS, tf_mode=TF_MODE, compute_dtype=jnp.bfloat16,
    )
    # Loose sanity check vs the exact-f32 module semantics.
    ref_f32 = _reference(
        x, weight, gamma, beta, running_mean, running_var,
        bn_eps=BN_EPS, tf_mode=TF_MODE, compute_dtype=jnp.float32,
    )

    assert out.shape == ref_f32.shape, (out.shape, ref_f32.shape)
    assert jnp.allclose(out_f32, ref_bf16, atol=3e-2, rtol=3e-2), \
        float(jnp.max(jnp.abs(out_f32 - ref_bf16)))
    assert jnp.allclose(out_f32, ref_f32, atol=2e-1, rtol=2e-1), \
        float(jnp.max(jnp.abs(out_f32 - ref_f32)))

    print("KERNEL_OK")
</pallas_src>

<mosaic_0001>
module attributes {stable_mosaic.version = 11 : i64} {
  func.func @_gemm_bn_relu_kernel(%arg0: i32, %arg1: i32, %arg2: memref<1x32x128xbf16, #tpu.memory_space<vmem>>, %arg3: memref<32x32xbf16, #tpu.memory_space<vmem>>, %arg4: memref<32x1xf32, #tpu.memory_space<vmem>>, %arg5: memref<1x32x128xbf16, #tpu.memory_space<vmem>>) attributes {dimension_semantics = [#tpu.dimension_semantics<parallel>, #tpu.dimension_semantics<parallel>], iteration_bounds = array<i64: 2, 1>, scalar_prefetch = 0 : i64, scratch_operands = 0 : i64, tpu.core_type = #tpu.core_type<tc>, window_params = [{transform_indices = @transform_0, window_bounds = array<i64: 1, 32, 128>}, {pipeline_mode = #tpu.pipeline_mode<synchronous>, transform_indices = @transform_1, window_bounds = array<i64: 32, 32>}, {pipeline_mode = #tpu.pipeline_mode<synchronous>, transform_indices = @transform_2, window_bounds = array<i64: 32, 1>}, {transform_indices = @transform_3, window_bounds = array<i64: 1, 32, 128>}]} {
    %c0 = arith.constant 0 : index
    %c0_0 = arith.constant 0 : index
    %0 = vector.load %arg3[%c0, %c0_0] : memref<32x32xbf16, #tpu.memory_space<vmem>>, vector<32x32xbf16>
    %c0_1 = arith.constant 0 : index
    %c0_2 = arith.constant 0 : index
    %c0_3 = arith.constant 0 : index
    %1 = vector.load %arg2[%c0_1, %c0_2, %c0_3] : memref<1x32x128xbf16, #tpu.memory_space<vmem>>, vector<1x32x128xbf16>
    %2 = vector.shape_cast %1 : vector<1x32x128xbf16> to vector<32x128xbf16>
    %cst = arith.constant dense<0.000000e+00> : vector<32x128xf32>
    %3 = tpu.matmul %0, %2, %cst {dimension_numbers = #tpu.dot_dimension_numbers<[1], [0], [0], [1], [0, 0, 1, 1], [], []>} : vector<32x32xbf16>, vector<32x128xbf16>, vector<32x128xf32> -> vector<32x128xf32>
    %c0_4 = arith.constant 0 : index
    %c0_5 = arith.constant 0 : index
    %4 = vector.load %arg4[%c0_4, %c0_5] : memref<32x1xf32, #tpu.memory_space<vmem>>, vector<32x1xf32>
    %5 = vector.broadcast %4 : vector<32x1xf32> to vector<32x128xf32>
    %6 = arith.addf %3, %5 : vector<32x128xf32>
    %cst_6 = arith.constant 0.000000e+00 : f32
    %7 = vector.broadcast %cst_6 : f32 to vector<32x128xf32>
    %8 = arith.maximumf %6, %7 : vector<32x128xf32>
    %9 = arith.truncf %8 : vector<32x128xf32> to vector<32x128xbf16>
    %c0_7 = arith.constant 0 : index
    %c0_8 = arith.constant 0 : index
    %c0_9 = arith.constant 0 : index
    %10 = vector.load %arg5[%c0_7, %c0_8, %c0_9] : memref<1x32x128xbf16, #tpu.memory_space<vmem>>, vector<1x32x128xbf16>
    %11 = vector.shape_cast %10 : vector<1x32x128xbf16> to vector<32x128xbf16>
    %12 = vector.shape_cast %9 : vector<32x128xbf16> to vector<1x32x128xbf16>
    tpu.vector_store %arg5[%c0_7, %c0_8, %c0_9], %12 {strides = array<i32>} : memref<1x32x128xbf16, #tpu.memory_space<vmem>>, vector<1x32x128xbf16>,
    return
  }
  func.func @transform_0(%arg0: i32, %arg1: i32) -> (i32, i32, i32) {
    %c0_i32 = arith.constant 0 : i32
    %c0_i32_0 = arith.constant 0 : i32
    return %arg0, %c0_i32, %arg1 : i32, i32, i32
  }
  func.func @transform_1(%arg0: i32, %arg1: i32) -> (i32, i32) {
    %c0_i32 = arith.constant 0 : i32
    %c0_i32_0 = arith.constant 0 : i32
    %c0_i32_1 = arith.constant 0 : i32
    return %c0_i32, %c0_i32_0 : i32, i32
  }
  func.func @transform_2(%arg0: i32, %arg1: i32) -> (i32, i32) {
    %c0_i32 = arith.constant 0 : i32
    %c0_i32_0 = arith.constant 0 : i32
    %c0_i32_1 = arith.constant 0 : i32
    return %c0_i32, %c0_i32_0 : i32, i32
  }
  func.func @transform_3(%arg0: i32, %arg1: i32) -> (i32, i32, i32) {
    %c0_i32 = arith.constant 0 : i32
    %c0_i32_0 = arith.constant 0 : i32
    return %arg0, %c0_i32, %arg1 : i32, i32, i32
  }
}

</mosaic_0001>

<bundles_post_ra>
// kernel: tpu_custom_call.1
= control target key start
LH: loop header
LB: loop body
LE: loop exit
PB: predicated region body
PF: predicated region fallthrough
CT: control target
= control target key end

     0   :  { %8 = vsyncpa [#allocation3], 0  ;;  %s788_s0 = inlined_call_operand.vmem [shape: bf16[2,32,128], index: 0, kind: input, shape index: {}]   ;;  %s789_s1 = inlined_call_operand.hbm [shape: bf16[32,32], index: 1, kind: input, shape index: {}]   ;;  %s790_s2 = inlined_call_operand.vmem [shape: f32[32,1], index: 2, kind: input, shape index: {}]   ;;  %s791_s3 = inlined_call_operand.hbm [shape: bf16[2,32,128], index: 3, kind: output, shape index: {}]  }
   0x1   :  { %9 = vsyncpa [#allocation4], 0 }
   0x2   :  { %11 = vsyncpa [#allocation4 + $0x1], 0  ;;  %s676_s12 = smov 0   ;;  %s678_s13 = smov 0  }
   0x3   :  { %s680_s14 = smov 0   ;;  %s682_s15 = smov 0  }
   0x4   :  { %s684_s16 = smov 0   ;;  %s686_s17 = smov 0  }
   0x5 LB: > { %s411_s18 = sadd.s32 4294967295, %s648_s17   ;;  %s412_s19 = sadd.s32 4294967294, %s648_s17   ;;  %s648_s17 = sphi %s686_s17, %s17_s17   ;;  %s644_s16 = sphi %s684_s16, %s798_s16   ;;  %s640_s15 = sphi %s682_s15, %s797_s15   ;;  %s636_s14 = sphi %s680_s14, %s796_s14   ;;  %s632_s13 = sphi %s678_s13, %s795_s13   ;;  %s628_s12 = sphi %s676_s12, %s794_s12  }
   0x6   : > { %s29_s20 = sadd.s32 1, %s644_s16  ;;  %s108_s21 = sadd.s32 1, %s636_s14 }
   0x7   : > { %p31_p0 = scmp.ge.s32.totalorder %s29_s20, 2  ;;  %p118_p1 = scmp.ne.s32.totalorder %s636_s14, %s632_s13 }
   0x8   : > { %p119_p2 = scmp.eq.s32.totalorder %s411_s18, 1  ;;  %p124_p3 = scmp.ne.s32.totalorder %s632_s13, %s628_s12 }
   0x9   : > { %s800_s20 = smov (%p31_p0, %s29_s20), 0  ;;  %p125_p5 = scmp.eq.s32.totalorder %s412_s19, 1 }
   0xa   : > { %p716_p4 = por %p119_p2, %p118_p1  ;;  %s103_s23 = ssub.s32 %s644_s16, %s800_s20 }
   0xb   : > { %p413_p6 = scmp.ge.s32.totalorder %s648_s17, 1  ;;  %p106_p7 = scmp.eq.s32.totalorder %s103_s23, 0 }
   0xc   : > { %p723_p8 = por %p125_p5, %p124_p3  ;;  %p132_p9 = scmp.lt.s32.totalorder %s648_s17, 3 }
   0xd   : > { %s729_s25 = scalar_select %p106_p7, %s636_s14, %s108_s21  }
   0xe   : > { %p133_p10 = pnand %p413_p6, %p132_p9  ;;  %p477_p11 = scmp.eq.s32.totalorder %s411_s18, 0 }
   0xf   : > { %s143_s28 = sshll.u32 %s789_s1, 4  ;;  %s650_s29 = smov [#allocation2]   ;;  %s144_s28 = int_to_ptr.hbm [resolvable:$true] %s143_s28 }
  0x10   : > { %p469_p12 = pneg %p133_p10  ;;  %s145_s30 = sshll.u32 %s650_s29, 4  ;;  %s146_s30 = int_to_ptr.vmem [resolvable:$true] %s145_s30 }
  0x11   : > { %s651_s4 = smov 64   ;;  %s652_s5 = smov 4  }
  0x12   : > { %p470_p13 = pnand %p477_p11, %p469_p12  ;;  %175 = sbr.rel (%p133_p10) target bundleno = 183 (0xb7), region = 32 }
  0x14   : > { %472 = dma.hbm_to_vmem [thread:$0]  (!%p470_p13), %s144_s28, 256, %s146_s30, [#allocation3], %s651_s4, %s651_s4, %s652_s5  }
  0x17   : > { %619 = dma.done.wait (%p477_p11), [#allocation3], 256  }
  0x18   : > { %621 = vsyncadd (%p477_p11), [#allocation3], 4294967040  ;;  %p203_p0 = scmp.lt.s32.totalorder %s640_s15, 1  ;;  %v653_v0 = vmov 0   ;;  %v222_v2 = vld [vmem:[%s790_s2 + $0x10] sm:$0xff]  ;;  %v220_v3 = vld [vmem:[%s790_s2] sm:$0xff] }
  0x19   : > { %535 = vset.pattern.permute.xlu1 %v653_v0  ;;  %534 = vset.pattern.permute.xlu0 %v653_v0  ;;  %v445_v5 = vld [vmem:[#allocation2] sm:$0xff]  ;;  %v446_v6 = vld [vmem:[#allocation2 + $0x8] sm:$0xff]  ;;  %vm266_vm0 = vcmask 261120   ;;  %v223_v7 = vld [vmem:[%s790_s2 + $0x18] sm:$0xff]  ;;  %s200_s29 = sand.u32 1, %s632_s13   ;;  %s449_s4 = sshll.u32 %s640_s15, 4 }
  0x1a   : > { %s204_s6 = scalar_select %p203_p0, %s640_s15, 1  ;;  %236 = vperm.xlu1 %535, %v222_v2   ;;  %226 = vperm.xlu0 %534, %v220_v3   ;;  %v221_v8 = vld [vmem:[%s790_s2 + $0x8] sm:$0xff] }
  0x1b   : > { %s418_s30 = sshll.u32 %s200_s29, 4  ;;  %s586_s23 = scalar_lea.hbm %s791_s3, 32 }
  0x1c   : > { %s444_s7 = sshll.u32 %s204_s6, 4  ;;  %s202_s8 = scalar_lea.vmem [#allocation5], %s418_s30 }
  0x1d   : > { %s210_s10 = scalar_lea.vmem %s788_s0, %s444_s7  ;;  %s317_s7 = scalar_lea.hbm %s791_s3, %s449_s4 }
  0x1e   : > { %v448_v1 = vld [vmem:[%s210_s10 + $0x8] sm:$0xff]  ;;  %v447_v4 = vld [vmem:[%s210_s10] sm:$0xff]  ;;  %s318_s9 = sshll.u32 %s202_s8, 4  ;;  %s320_s15 = sshll.u32 %s317_s7, 4  ;;  %s319_s9 = int_to_ptr.vmem [resolvable:$true] %s318_s9  ;;  %s321_s15 = int_to_ptr.hbm [resolvable:$true] %s320_s15 }
  0x1f   : > { %279 = vmatpush.bf16.msra.mxu0 %v448_v1  ;;  %461 = vmatpush.bf16.msra.mxu1 %v448_v1  ;;  %s305_s10 = scalar_lea.sflag [#allocation4], %s200_s29  ;;  %s580_s11 = sshra.s32 %s321_s15, 4  ;;  %s581_s11 = int_to_ptr.hbm [resolvable:$true] %s580_s11 }
  0x20   : > { %s582_s18 = scalar_lea.hbm %s581_s11, 16  ;;  %p587_p5 = scmp.lt.s32.totalorder %s581_s11, %s791_s3 }
  0x21   : > { %p583_p1 = scmp.ne.s32.totalorder %s581_s11, %s582_s18  ;;  %p588_p6 = scmp.lt.s32.totalorder %s586_s23, %s582_s18 }
  0x22   : > { %241 = vperm.xlu1 %535, %v223_v7   ;;  %231 = vperm.xlu0 %534, %v221_v8  }
  0x23   : > { %280 = vmatpush.bf16.msra.mxu0 %v447_v4  ;;  %462 = vmatpush.bf16.msra.mxu1 %v447_v4  ;;  %p584_p2 = pnand %p583_p1, %p716_p4  ;;  %p589_p7 = por %p588_p6, %p587_p5 }
  0x25   : > { %p585_p3 = pneg %p584_p2 }
  0x26   : > { %437 = vmatmul.msk.bf16.vlgmr.msra.gmra.mxu0 %vm266_vm0, %v445_v5  ;;  %438 = vmatmul.msk.bf16.vlgmr.msra.gmra.mxu1 %vm266_vm0, %v446_v6 }
  0x27   : > { %p590_p9 = pnand %p589_p7, %p585_p3 }
  0x8c   : > { %v237_v9 = vpop.permute.xlu1 %236  ;;  %v227_v10 = vpop.permute.xlu0 %226 }
  0x94   : > { %v242_v13 = vpop.permute.xlu1 %241  ;;  %v232_v14 = vpop.permute.xlu0 %231 }
  0xa3   : > { %v282_v11 = vpop.f32.mrf.mxu0  ;;  %v287_v12 = vpop.f32.mrf.mxu1 }
  0xa4   : > { %v283_v15 = vadd.f32 %v282_v11, %v227_v10  ;;  %v288_v16 = vadd.f32 %v287_v12, %v237_v9 }
  0xa6   : > { %v292_v21 = vmax.f32 %v283_v15, 0.0  ;;  %v294_v22 = vmax.f32 %v288_v16, 0.0 }
  0xab   : > { %v284_v17 = vpop.f32.mrf.mxu0  ;;  %v289_v18 = vpop.f32.mrf.mxu1 }
  0xac   : > { %v285_v19 = vadd.f32 %v284_v17, %v232_v14  ;;  %v290_v20 = vadd.f32 %v289_v18, %v242_v13 }
  0xae   : > { %v293_v23 = vmax.f32 %v285_v19, 0.0  ;;  %v295_v24 = vmax.f32 %v290_v20, 0.0 }
  0xb0   : > { %v453_v25 = vpack.c.bf16 %v293_v23, %v292_v21  ;;  %v458_v26 = vpack.c.bf16 %v295_v24, %v294_v22 }
  0xb2   : > { %454 = vst [vmem:[%s202_s8] sm:$0xff] %v453_v25  }
  0xb3   : > { %460 = vst [vmem:[%s202_s8 + $0x8] sm:$0xff] %v458_v26  }
  0xb4   : > { %593 = shalt.err (!%p590_p9)
}
  0xb5   : > { %s654_s28 = smov 64   ;;  %s655_s29 = smov 4  }
  0xb6   : > { %467 = dma.vmem_to_hbm [thread:$0]  (%p716_p4), %s319_s9, 256, %s321_s15, %s305_s10, %s654_s28, %s654_s28, %s655_s29  }
  0xb7 PF: > { %p479_p10 = scmp.ge.s32.totalorder %s648_s17, 2  ;;  %s335_s30 = sand.u32 1, %s628_s12  }
  0xb8   : > { %s336_s4 = scalar_lea.sflag [#allocation4], %s335_s30 }
  0xb9   : > { %p474_p11 = pnand %p479_p10, %p723_p8 }
  0xbb   : > { %p475_p12 = pneg %p474_p11 }
  0xbd   : > { %623 = dma.done.wait (%p475_p12), %s336_s4, 256  }
  0xbe   : > { %625 = vsyncadd (%p475_p12), %s336_s4, 4294967040  ;;  %s17_s17 = sadd.s32 1, %s648_s17   ;;  %s794_s12 = smov %s632_s13 }
  0xbf   : > { %p14_p13 = scmp.ge.s32.totalorder %s17_s17, 4   ;;  %s795_s13 = smov %s636_s14 }
  0xc0   : > { %s796_s14 = smov %s729_s25  ;;  %s797_s15 = smov %s644_s16 }
  0xc1   : > { %s798_s16 = smov %s800_s20  ;;  %16 = sbr.rel (!%p14_p13) target bundleno = 5 (0x5), region = 72 }
  0xc6   :  { %342 = vsyncpa [#allocation3], 1 }
  0xc7   :  { %344 = vsyncpa [#allocation3 + $0x1], 1 }
  0xc8   :  { %345 = vsyncpa [#allocation4], 1 }
  0xc9   :  { %347 = vsyncpa [#allocation4 + $0x1], 1 }

</bundles_post_ra>
